<compile_context>
chip_gen: v7x
topology: tpu7x:2x2x1
jax: 0.10.0
libtpu: 0.0.40
codegen_flags: <defaults>
</compile_context>

<pallas_src>
import jax
import jax.numpy as jnp
from jax import lax
from jax.experimental import pallas as pl
from jax.experimental.pallas import tpu as pltpu


def _round_up(x, m):
    return (x + m - 1) // m * m


def _choose_tile_b(batch):
    """Batch-tile heuristic:
       * B < 16  -> one tile (round up to 8 sublanes),
       * else    -> >= 2 grid steps (v7x megacore sharding), capped at 2048
                    rows so activations stay far under VMEM on every chip."""
    if batch < 16:
        return _round_up(max(batch, 8), 8)
    half = _round_up((batch + 1) // 2, 8)
    return min(2048, half)


def qnetwork_kernel(state_ref, action_ref, w1s_ref, w1a_ref, b1_ref,
                    w2_ref, b2_ref, w3_ref, b3_ref, out_ref):
    """Fused 3-layer MLP on one batch tile.

    state_ref : (TB, S)  bf16   w1s_ref: (S, Hp)  bf16   b1_ref: (1, Hp) f32
    action_ref: (TB, A)  bf16   w1a_ref: (A, Hp)  bf16   b2_ref: (1, Hp) f32
                                w2_ref : (Hp, Hp) bf16   w3_ref: (1, Hp) bf16
    b3_ref    : (1, 1)   f32 scalar in SMEM
    out_ref   : (1, TB)  f32  (lane-dense output row for this tile)
    """
    s = state_ref[...]                        # bf16, no in-kernel cast
    a = action_ref[...]

    # Layer 1: fused "concat" matmul as two MXU dots (f32 accumulate) + ReLU.
    # TODO(synk): optionally merge into one K=S+A MXU pass via in-register concat.
    h1 = jnp.dot(s, w1s_ref[...], preferred_element_type=jnp.float32)
    h1 = h1 + jnp.dot(a, w1a_ref[...], preferred_element_type=jnp.float32)
    h1 = jnp.maximum(h1 + b1_ref[...], 0.0)                       # (TB, Hp) f32

    # Layer 2: MXU dot + ReLU.
    h2 = jnp.dot(h1.astype(w2_ref.dtype), w2_ref[...],
                 preferred_element_type=jnp.float32)
    h2 = jnp.maximum(h2 + b2_ref[...], 0.0)                       # (TB, Hp) f32

    # Layer 3: lane-dense (1, TB) row via an M=1 MXU pass (replaces the
    # lane-sparse (TB, 1) masked-store epilogue).
    q_row = lax.dot_general(w3_ref[...], h2.astype(w3_ref.dtype),
                            dimension_numbers=(((1,), (1,)), ((), ())),
                            preferred_element_type=jnp.float32)   # (1, TB)
    out_ref[...] = (q_row + b3_ref[0, 0]).astype(out_ref.dtype)


@jax.jit
def qnetwork_forward(state, action, kernel_params):
    """state: (B, S) f32, action: (B, A) f32 -> (B, 1) f32."""
    w1s, w1a, b1, w2, b2, w3, b3 = kernel_params
    B, S = state.shape
    A = action.shape[1]
    Hp = w2.shape[0]

    TB = _choose_tile_b(B)
    B_pad = _round_up(B, TB)
    num_tiles = B_pad // TB

    # bf16 inputs halve streamed-activation DMA bytes; the MXU consumes bf16
    # anyway and accumulation stays f32, so numerics are unchanged.
    state = state.astype(jnp.bfloat16)
    action = action.astype(jnp.bfloat16)
    if B_pad != B:
        state = jnp.pad(state, ((0, B_pad - B), (0, 0)))
        action = jnp.pad(action, ((0, B_pad - B), (0, 0)))

    # Grid-invariant weights (index_map constant -> DMA'd once, stay resident).
    # Note: pl.Buffered(1) would trim the second VMEM copy of each weight if
    # hidden_dim grows toward 512-1024; negligible at Hp=128 so not applied.
    const_spec = lambda arr: pl.BlockSpec(arr.shape, lambda i: (0, 0))

    weight_bytes = ((w1s.size + w1a.size + w2.size + w3.size) * 2
                    + (b1.size + b2.size + 1) * 4)
    cost = pl.CostEstimate(
        flops=2 * B_pad * ((S + A) * Hp + Hp * Hp + Hp),
        transcendentals=0,
        bytes_accessed=B_pad * (S + A) * 2 + weight_bytes + B_pad * 4,
    )

    out = pl.pallas_call(
        qnetwork_kernel,
        out_shape=jax.ShapeDtypeStruct((num_tiles, 1, TB), jnp.float32),
        grid=(num_tiles,),
        in_specs=[
            pl.BlockSpec((TB, S), lambda i: (i, 0)),               # state tile
            pl.BlockSpec((TB, A), lambda i: (i, 0)),               # action tile
            const_spec(w1s), const_spec(w1a), const_spec(b1),      # resident weights
            const_spec(w2), const_spec(b2), const_spec(w3),
            pl.BlockSpec(memory_space=pltpu.MemorySpace.SMEM),     # b3 scalar
        ],
        out_specs=pl.BlockSpec((None, 1, TB), lambda i: (i, 0, 0)),  # lane-dense
        compiler_params=pltpu.CompilerParams(
            dimension_semantics=("parallel",)),                    # 2 TCs on v7x
        cost_estimate=cost,
    )(state, action, w1s, w1a, b1, w2, b2, w3, b3)

    return out.reshape(B_pad, 1)[:B]


def init_qnetwork_params(key, state_dim, hidden_dim, action_dim):
    """nn.Linear-style U(-1/sqrt(fan_in)) init; weights stored (in, out)."""
    def linear(key, fan_in, fan_out):
        kw, kb = jax.random.split(key)
        bound = 1.0 / jnp.sqrt(float(fan_in))
        w = jax.random.uniform(kw, (fan_in, fan_out), jnp.float32, -bound, bound)
        b = jax.random.uniform(kb, (1, fan_out), jnp.float32, -bound, bound)
        return w, b

    k1, k2, k3 = jax.random.split(key, 3)
    w1, b1 = linear(k1, state_dim + action_dim, hidden_dim)
    w2, b2 = linear(k2, hidden_dim, hidden_dim)
    w3, b3 = linear(k3, hidden_dim, 1)
    return (w1, b1, w2, b2, w3, b3)


def prepare_kernel_params(params, state_dim, action_dim,
                          weight_dtype=jnp.bfloat16):
    """One-time prep: split W1, zero-pad hidden to 128 lanes, cast MXU weights."""
    w1, b1, w2, b2, w3, b3 = params
    H = w2.shape[0]
    pad_h = _round_up(H, 128) - H

    w1s = jnp.pad(w1[:state_dim], ((0, 0), (0, pad_h))).astype(weight_dtype)
    w1a = jnp.pad(w1[state_dim:], ((0, 0), (0, pad_h))).astype(weight_dtype)
    b1p = jnp.pad(b1, ((0, 0), (0, pad_h)))
    w2p = jnp.pad(w2, ((0, pad_h), (0, pad_h))).astype(weight_dtype)
    b2p = jnp.pad(b2, ((0, 0), (0, pad_h)))
    w3p = jnp.pad(w3.T, ((0, 0), (0, pad_h))).astype(weight_dtype)  # (1, Hp)
    b3p = b3.reshape(1, 1).astype(jnp.float32)                      # SMEM scalar
    return (w1s, w1a, b1p, w2p, b2p, w3p, b3p)


def qnetwork_reference(state, action, kernel_params):
    """Pure-JAX reference computing the same (bf16-weight, f32-accum) math."""
    w1s, w1a, b1, w2, b2, w3, b3 = kernel_params
    s = state.astype(w1s.dtype)
    a = action.astype(w1a.dtype)
    h1 = (jnp.dot(s, w1s, preferred_element_type=jnp.float32)
          + jnp.dot(a, w1a, preferred_element_type=jnp.float32))
    h1 = jax.nn.relu(h1 + b1)
    h2 = jnp.dot(h1.astype(w2.dtype), w2, preferred_element_type=jnp.float32)
    h2 = jax.nn.relu(h2 + b2)
    q = jnp.dot(h2.astype(w3.dtype), w3.T, preferred_element_type=jnp.float32)
    return q + b3[0, 0]


def qnetwork_reference_f32(state, action, raw_params):
    """Full-f32 math matching the original PyTorch module (fidelity check)."""
    w1, b1, w2, b2, w3, b3 = raw_params
    sa = jnp.concatenate([state, action], axis=1)
    h1 = jax.nn.relu(sa @ w1 + b1)
    h2 = jax.nn.relu(h1 @ w2 + b2)
    return h2 @ w3 + b3


if __name__ == "__main__":
    state_dim, hidden_dim, action_dim = 12, 32, 4
    batch = 8

    key = jax.random.PRNGKey(0)
    k_params, k_state, k_action = jax.random.split(key, 3)

    raw_params = init_qnetwork_params(k_params, state_dim, hidden_dim, action_dim)
    kernel_params = prepare_kernel_params(raw_params, state_dim, action_dim)

    state = jax.random.normal(k_state, (batch, state_dim), jnp.float32)
    action = jax.random.normal(k_action, (batch, action_dim), jnp.float32)

    q = qnetwork_forward(state, action, kernel_params)
    q = jax.block_until_ready(q)
    assert q.shape == (batch, 1), q.shape

    # Tight check vs. an identically-quantized (bf16 weights, f32 accum) reference.
    q_ref = qnetwork_reference(state, action, kernel_params)
    assert jnp.allclose(q, q_ref, atol=5e-3, rtol=5e-3), (q, q_ref)

    # Loose fidelity check vs. the original full-f32 PyTorch-equivalent math
    # (bf16 weight quantization contributes ~0.5% relative error per layer).
    q_f32 = qnetwork_reference_f32(state, action, raw_params)
    assert jnp.allclose(q, q_f32, atol=5e-2, rtol=5e-2), (q, q_f32)

    print("KERNEL_OK")
</pallas_src>

<mosaic_0001>
module attributes {stable_mosaic.version = 11 : i64} {
  func.func @qnetwork_kernel(%arg0: i32, %arg1: memref<8x12xbf16, #tpu.memory_space<vmem>>, %arg2: memref<8x4xbf16, #tpu.memory_space<vmem>>, %arg3: memref<12x128xbf16, #tpu.memory_space<vmem>>, %arg4: memref<4x128xbf16, #tpu.memory_space<vmem>>, %arg5: memref<1x128xf32, #tpu.memory_space<vmem>>, %arg6: memref<128x128xbf16, #tpu.memory_space<vmem>>, %arg7: memref<1x128xf32, #tpu.memory_space<vmem>>, %arg8: memref<1x128xbf16, #tpu.memory_space<vmem>>, %arg9: memref<1x1xf32, #tpu.memory_space<smem>>, %arg10: memref<1x1x8xf32, #tpu.memory_space<vmem>>) attributes {dimension_semantics = [#tpu.dimension_semantics<parallel>], iteration_bounds = array<i64: 1>, scalar_prefetch = 0 : i64, scratch_operands = 0 : i64, tpu.core_type = #tpu.core_type<tc>, window_params = [{transform_indices = @transform_0, window_bounds = array<i64: 8, 12>}, {transform_indices = @transform_1, window_bounds = array<i64: 8, 4>}, {pipeline_mode = #tpu.pipeline_mode<synchronous>, transform_indices = @transform_2, window_bounds = array<i64: 12, 128>}, {pipeline_mode = #tpu.pipeline_mode<synchronous>, transform_indices = @transform_3, window_bounds = array<i64: 4, 128>}, {pipeline_mode = #tpu.pipeline_mode<synchronous>, transform_indices = @transform_4, window_bounds = array<i64: 1, 128>}, {pipeline_mode = #tpu.pipeline_mode<synchronous>, transform_indices = @transform_5, window_bounds = array<i64: 128, 128>}, {pipeline_mode = #tpu.pipeline_mode<synchronous>, transform_indices = @transform_6, window_bounds = array<i64: 1, 128>}, {pipeline_mode = #tpu.pipeline_mode<synchronous>, transform_indices = @transform_7, window_bounds = array<i64: 1, 128>}, {transform_indices = @transform_8, window_bounds = array<i64: 1, 1>}, {transform_indices = @transform_9, window_bounds = array<i64: 1, 1, 8>}]} {
    %c0 = arith.constant 0 : index
    %c0_0 = arith.constant 0 : index
    %0 = vector.load %arg1[%c0, %c0_0] : memref<8x12xbf16, #tpu.memory_space<vmem>>, vector<8x12xbf16>
    %c0_1 = arith.constant 0 : index
    %c0_2 = arith.constant 0 : index
    %1 = vector.load %arg2[%c0_1, %c0_2] : memref<8x4xbf16, #tpu.memory_space<vmem>>, vector<8x4xbf16>
    %c0_3 = arith.constant 0 : index
    %c0_4 = arith.constant 0 : index
    %2 = vector.load %arg3[%c0_3, %c0_4] : memref<12x128xbf16, #tpu.memory_space<vmem>>, vector<12x128xbf16>
    %cst = arith.constant dense<0.000000e+00> : vector<8x128xf32>
    %3 = tpu.matmul %0, %2, %cst {dimension_numbers = #tpu.dot_dimension_numbers<[1], [0], [0], [1], [0, 0, 1, 1], [], []>} : vector<8x12xbf16>, vector<12x128xbf16>, vector<8x128xf32> -> vector<8x128xf32>
    %c0_5 = arith.constant 0 : index
    %c0_6 = arith.constant 0 : index
    %4 = vector.load %arg4[%c0_5, %c0_6] : memref<4x128xbf16, #tpu.memory_space<vmem>>, vector<4x128xbf16>
    %cst_7 = arith.constant dense<0.000000e+00> : vector<8x128xf32>
    %5 = tpu.matmul %1, %4, %cst_7 {dimension_numbers = #tpu.dot_dimension_numbers<[1], [0], [0], [1], [0, 0, 1, 1], [], []>} : vector<8x4xbf16>, vector<4x128xbf16>, vector<8x128xf32> -> vector<8x128xf32>
    %6 = arith.addf %3, %5 : vector<8x128xf32>
    %c0_8 = arith.constant 0 : index
    %c0_9 = arith.constant 0 : index
    %7 = vector.load %arg5[%c0_8, %c0_9] : memref<1x128xf32, #tpu.memory_space<vmem>>, vector<1x128xf32>
    %8 = vector.broadcast %7 : vector<1x128xf32> to vector<8x128xf32>
    %9 = arith.addf %6, %8 : vector<8x128xf32>
    %cst_10 = arith.constant 0.000000e+00 : f32
    %10 = vector.broadcast %cst_10 : f32 to vector<8x128xf32>
    %11 = arith.maximumf %9, %10 : vector<8x128xf32>
    %12 = arith.truncf %11 : vector<8x128xf32> to vector<8x128xbf16>
    %c0_11 = arith.constant 0 : index
    %c0_12 = arith.constant 0 : index
    %13 = vector.load %arg6[%c0_11, %c0_12] : memref<128x128xbf16, #tpu.memory_space<vmem>>, vector<128x128xbf16>
    %cst_13 = arith.constant dense<0.000000e+00> : vector<8x128xf32>
    %14 = tpu.matmul %12, %13, %cst_13 {dimension_numbers = #tpu.dot_dimension_numbers<[1], [0], [0], [1], [0, 0, 1, 1], [], []>} : vector<8x128xbf16>, vector<128x128xbf16>, vector<8x128xf32> -> vector<8x128xf32>
    %c0_14 = arith.constant 0 : index
    %c0_15 = arith.constant 0 : index
    %15 = vector.load %arg7[%c0_14, %c0_15] : memref<1x128xf32, #tpu.memory_space<vmem>>, vector<1x128xf32>
    %16 = vector.broadcast %15 : vector<1x128xf32> to vector<8x128xf32>
    %17 = arith.addf %14, %16 : vector<8x128xf32>
    %cst_16 = arith.constant 0.000000e+00 : f32
    %18 = vector.broadcast %cst_16 : f32 to vector<8x128xf32>
    %19 = arith.maximumf %17, %18 : vector<8x128xf32>
    %c0_17 = arith.constant 0 : index
    %c0_18 = arith.constant 0 : index
    %20 = vector.load %arg8[%c0_17, %c0_18] : memref<1x128xbf16, #tpu.memory_space<vmem>>, vector<1x128xbf16>
    %21 = arith.truncf %19 : vector<8x128xf32> to vector<8x128xbf16>
    %cst_19 = arith.constant dense<0.000000e+00> : vector<1x8xf32>
    %22 = tpu.matmul %20, %21, %cst_19 {dimension_numbers = #tpu.dot_dimension_numbers<[1], [1], [0], [0], [0, 0, 1, 0], [], []>} : vector<1x128xbf16>, vector<8x128xbf16>, vector<1x8xf32> -> vector<1x8xf32>
    %c0_20 = arith.constant 0 : index
    %c0_21 = arith.constant 0 : index
    %23 = memref.load %arg9[%c0_20, %c0_21] : memref<1x1xf32, #tpu.memory_space<smem>>
    %24 = vector.broadcast %23 : f32 to vector<1x8xf32>
    %25 = arith.addf %22, %24 : vector<1x8xf32>
    %c0_22 = arith.constant 0 : index
    %c0_23 = arith.constant 0 : index
    %c0_24 = arith.constant 0 : index
    %26 = vector.load %arg10[%c0_22, %c0_23, %c0_24] : memref<1x1x8xf32, #tpu.memory_space<vmem>>, vector<1x1x8xf32>
    %27 = vector.shape_cast %26 : vector<1x1x8xf32> to vector<1x8xf32>
    %28 = vector.shape_cast %25 : vector<1x8xf32> to vector<1x1x8xf32>
    tpu.vector_store %arg10[%c0_22, %c0_23, %c0_24], %28 {strides = array<i32>} : memref<1x1x8xf32, #tpu.memory_space<vmem>>, vector<1x1x8xf32>,
    return
  }
  func.func @transform_0(%arg0: i32) -> (i32, i32) {
    %c0_i32 = arith.constant 0 : i32
    %c0_i32_0 = arith.constant 0 : i32
    return %arg0, %c0_i32 : i32, i32
  }
  func.func @transform_1(%arg0: i32) -> (i32, i32) {
    %c0_i32 = arith.constant 0 : i32
    %c0_i32_0 = arith.constant 0 : i32
    return %arg0, %c0_i32 : i32, i32
  }
  func.func @transform_2(%arg0: i32) -> (i32, i32) {
    %c0_i32 = arith.constant 0 : i32
    %c0_i32_0 = arith.constant 0 : i32
    %c0_i32_1 = arith.constant 0 : i32
    return %c0_i32, %c0_i32_0 : i32, i32
  }
  func.func @transform_3(%arg0: i32) -> (i32, i32) {
    %c0_i32 = arith.constant 0 : i32
    %c0_i32_0 = arith.constant 0 : i32
    %c0_i32_1 = arith.constant 0 : i32
    return %c0_i32, %c0_i32_0 : i32, i32
  }
  func.func @transform_4(%arg0: i32) -> (i32, i32) {
    %c0_i32 = arith.constant 0 : i32
    %c0_i32_0 = arith.constant 0 : i32
    %c0_i32_1 = arith.constant 0 : i32
    return %c0_i32, %c0_i32_0 : i32, i32
  }
  func.func @transform_5(%arg0: i32) -> (i32, i32) {
    %c0_i32 = arith.constant 0 : i32
    %c0_i32_0 = arith.constant 0 : i32
    %c0_i32_1 = arith.constant 0 : i32
    return %c0_i32, %c0_i32_0 : i32, i32
  }
  func.func @transform_6(%arg0: i32) -> (i32, i32) {
    %c0_i32 = arith.constant 0 : i32
    %c0_i32_0 = arith.constant 0 : i32
    %c0_i32_1 = arith.constant 0 : i32
    return %c0_i32, %c0_i32_0 : i32, i32
  }
  func.func @transform_7(%arg0: i32) -> (i32, i32) {
    %c0_i32 = arith.constant 0 : i32
    %c0_i32_0 = arith.constant 0 : i32
    %c0_i32_1 = arith.constant 0 : i32
    return %c0_i32, %c0_i32_0 : i32, i32
  }
  func.func @transform_8(%arg0: i32) -> (i32, i32) {
    %c0_i32 = arith.constant 0 : i32
    %c0_i32_0 = arith.constant 0 : i32
    %c0_i32_1 = arith.constant 0 : i32
    return %c0_i32, %c0_i32_0 : i32, i32
  }
  func.func @transform_9(%arg0: i32) -> (i32, i32, i32) {
    %c0_i32 = arith.constant 0 : i32
    %c0_i32_0 = arith.constant 0 : i32
    %c0_i32_1 = arith.constant 0 : i32
    return %arg0, %c0_i32, %c0_i32_0 : i32, i32, i32
  }
}

</mosaic_0001>

<bundles_post_ra>
// kernel: qnetwork_forward.1
= control target key start
LH: loop header
LB: loop body
LE: loop exit
PB: predicated region body
PF: predicated region fallthrough
CT: control target
= control target key end

     0   :  { %15 = vsyncpa [#allocation4], 0  ;;  %s575_s0 = inlined_call_operand.vmem [shape: bf16[8,12], index: 0, kind: input, shape index: {}]   ;;  %s576_s1 = inlined_call_operand.vmem [shape: bf16[8,4], index: 1, kind: input, shape index: {}]   ;;  %s577_s2 = inlined_call_operand.vmem [shape: bf16[12,128], index: 2, kind: input, shape index: {}]   ;;  %s578_s3 = inlined_call_operand.vmem [shape: bf16[4,128], index: 3, kind: input, shape index: {}]   ;;  %s579_s4 = inlined_call_operand.vmem [shape: f32[1,128], index: 4, kind: input, shape index: {}]   ;;  %s580_s5 = inlined_call_operand.hbm [shape: bf16[128,128], index: 5, kind: input, shape index: {}]   ;;  %s581_s6 = inlined_call_operand.vmem [shape: f32[1,128], index: 6, kind: input, shape index: {}]   ;;  %s582_s7 = inlined_call_operand.vmem [shape: bf16[1,128], index: 7, kind: input, shape index: {}]   ;;  %s583_s8 = inlined_call_operand.<no memory space> [shape: f32[1,1], index: 8, kind: input, shape index: {}]   ;;  %s584_s9 = inlined_call_operand.hbm [shape: f32[1,1,8], index: 9, kind: output, shape index: {}]  }
   0x1   :  { %16 = vsyncpa [#allocation5], 0  ;;  %s467_s30 = smov [#allocation3]   ;;  %s419_s13 = scalar_lea.hbm %s580_s5, 1024 }
   0x2   :  { %s32_s10 = sshll.u32 %s467_s30, 4  ;;  %p420_p0 = scmp.ne.s32.totalorder %s580_s5, %s419_s13  ;;  %s33_s10 = int_to_ptr.vmem [resolvable:$true] %s32_s10 }
   0x3   :  { %p423_p1 = scmp.lt.u32.totalorder %s419_s13, %s580_s5 }
   0x5   :  { %p425_p2 = pnand %p423_p1, %p420_p0 }
   0x7   :  { %428 = shalt.err (!%p425_p2)
}
   0x8   :  { %s429_s18 = scalar_lea.vmem %s33_s10, 1024  ;;  %p434_p4 = scmp.lt.s32.totalorder %s33_s10, %s33_s10 }
   0x9   :  { %p430_p3 = scmp.ne.s32.totalorder %s33_s10, %s429_s18  ;;  %p435_p5 = scmp.lt.s32.totalorder %s429_s18, %s429_s18 }
   0xb   :  { %p436_p6 = por %p435_p5, %p434_p4 }
   0xd   :  { %p437_p7 = pnand %p436_p6, %p430_p3 }
   0xf   :  { %440 = shalt.err (!%p437_p7)
}
  0x10   :  { %s468_s19 = smov 64   ;;  %s469_s20 = smov 4  }
  0x11   :  { %38 = dma.hbm_to_vmem [thread:$0]  %s580_s5, 1024, %s33_s10, [#allocation4], %s468_s19, %s468_s19, %s469_s20  }
  0x12   :  { %463 = dma.done.wait [#allocation4], 1024  }
  0x13   :  { %464 = vsyncadd [#allocation4], 4294966272  ;;  %v470_v0 = vmov 0.0   ;;  %vm471_vm0 = vmmov 0   ;;  %vm58_vm1 = vcmask 1041408   ;;  %vm54_vm2 = vcmask 31744  }
  0x14   :  { %366 = vmatprep.subr.bf16.mxu1 %v470_v0  ;;  %368 = vmatprep.mubr.msk.bf16.mxu1 %vm471_vm0, %v470_v0  ;;  %v53_v1 = vld [vmem:[%s578_s3] sm:$0x3]  ;;  %vm111_vm3 = vcmask 1045504   ;;  %v412_v7 = vld [vmem:[#allocation3 + $0x8] sm:$0xff]   ;;  %v413_v8 = vld [vmem:[#allocation3 + $0x10] sm:$0xff]   ;;  %vm107_vm4 = vcmask 97280   ;;  %v280_v37 = vstv %s583_s8 }
  0x15   :  { %378 = vmatprep.subr.bf16.mxu0 %v470_v0  ;;  %394 = vmatprep.mubr.msk.bf16.mxu0 %vm471_vm0, %v470_v0  ;;  %v60_v2 = vsel %vm58_vm1, %v53_v1, 0  ;;  %v410_v3 = vld [vmem:[%s577_s2] sm:$0x3f]   ;;  %v414_v10 = vld [vmem:[#allocation3 + $0x18] sm:$0xff]   ;;  %v416_v12 = vld [vmem:[#allocation3 + $0x28] sm:$0xff]   ;;  %s472_s12 = smov [#allocation6]  }
  0x16   :  { %v411_v4 = vld [vmem:[#allocation3] sm:$0xff]   ;;  %367 = vmatpush3.bf16.msra.mxu1 %v60_v2  ;;  %v113_v6 = vsel %vm111_vm3, %v410_v3, 0  ;;  %v417_v13 = vld [vmem:[#allocation3 + $0x30] sm:$0xff]   ;;  %v418_v14 = vld [vmem:[#allocation3 + $0x38] sm:$0xff]   ;;  %s329_s13 = sshll.u32 %s472_s12, 4  ;;  %vm321_vm5 = vcmask 57344   ;;  %s330_s13 = int_to_ptr.vmem [resolvable:$true] %s329_s13 }
  0x17   :  { %v50_v5 = vld [vmem:[%s576_s1] sm:$0xf]  ;;  %372 = vmatprep.subr.bf16.mxu1 %v470_v0  ;;  %379 = vmatpush3.bf16.msra.mxu0 %v411_v4  ;;  %s445_s14 = scalar_lea.vmem %s330_s13, 32  ;;  %p446_p9 = scmp.lt.s32.totalorder %s330_s13, %s330_s13 }
  0x18   :  { %380 = vmatprep.subr.bf16.mxu0 %v470_v0  ;;  %v49_v9 = vld [vmem:[%s575_s0] sm:$0xf] }
  0x19   :  { %369 = vmatmul.mubr.msk.bf16.vlgmr.msra.gmra.mrb[0].mxu1 %vm54_vm2, %v50_v5  ;;  %v415_v11 = vld [vmem:[#allocation3 + $0x20] sm:$0xff]  }
  0x1a   :  { %373 = vmatpush3.bf16.msra.mxu1 %v113_v6  ;;  %374 = vmatprep.mubr.msk.bf16.mxu1 %vm471_vm0, %v470_v0  ;;  %v341_v20 = vld [vmem:[%s579_s4] ss:$0 sm:$0xff] }
  0x1b   :  { %381 = vmatpush3.bf16.msra.mxu0 %v412_v7  ;;  %398 = vmatprep.subr.bf16.mxu1 %v470_v0  ;;  %v342_v28 = vld [vmem:[%s581_s6] ss:$0 sm:$0xff]  ;;  %s441_s6 = scalar_lea.vmem %s330_s13, 16 }
  0x1c   :  { %382 = vmatprep.subr.bf16.mxu0 %v470_v0  ;;  %v277_v36 = vld [vmem:[%s582_s7] sm:$0x1]  ;;  %p442_p8 = scmp.ne.s32.totalorder %s330_s13, %s441_s6  ;;  %p447_p10 = scmp.lt.s32.totalorder %s445_s14, %s441_s6 }
  0x1e   :  { %p448_p11 = por %p447_p10, %p446_p9 }
  0x1f   :  { %383 = vmatpush3.bf16.msra.mxu0 %v413_v8 }
  0x20   :  { %384 = vmatprep.subr.bf16.mxu0 %v470_v0  ;;  %p449_p12 = pnand %p448_p11, %p442_p8 }
  0x21   :  { %375 = vmatmul.mubr.msk.bf16.vlgmr.msra.gmra.mrb[4].mxu1 %vm107_vm4, %v49_v9 }
  0x22   :  { %400 = vmatprep.mubr.msk.bf16.mxu1 %vm471_vm0, %v470_v0 }
  0x23   :  { %385 = vmatpush3.bf16.msra.mxu0 %v414_v10 }
  0x24   :  { %386 = vmatprep.subr.bf16.mxu0 %v470_v0 }
  0x27   :  { %387 = vmatpush3.bf16.msra.mxu0 %v415_v11 }
  0x28   :  { %388 = vmatprep.subr.bf16.mxu0 %v470_v0 }
  0x2b   :  { %389 = vmatpush3.bf16.msra.mxu0 %v416_v12 }
  0x2c   :  { %390 = vmatprep.subr.bf16.mxu0 %v470_v0 }
  0x2f   :  { %391 = vmatpush3.bf16.msra.mxu0 %v417_v13 }
  0x30   :  { %392 = vmatprep.subr.bf16.mxu0 %v470_v0 }
  0x33   :  { %393 = vmatpush3.bf16.msra.mxu0 %v418_v14 }
  0xec   :  { %v96_v15 = vpop.f32.mrb[0].mxu1 }
  0xed   :  { %v370_v16 = vpop.f32.mrb[1].mxu1 }
  0xee   :  { %v99_v17 = vpop.f32.mrb[2].mxu1 }
  0xef   :  { %v371_v18 = vpop.f32.mrb[3].mxu1 }
  0xf4   :  { %v149_v19 = vpop.f32.mrb[4].mxu1 }
  0xf5   :  { %v150_v21 = vadd.f32 %v149_v19, %v96_v15  ;;  %v376_v22 = vpop.f32.mrb[5].mxu1 }
  0xf6   :  { %v152_v23 = vpop.f32.mrb[6].mxu1 }
  0xf7   :  { %v162_v24 = vadd.f32 %v341_v20, %v150_v21  ;;  %v377_v25 = vpop.f32.mrb[7].mxu1 }
  0xf9   :  { %v163_v26 = vmax.f32 %v162_v24, 0.0 }
  0xfb   :  { %v164_v27 = vpack.c.bf16 %v163_v26, %v163_v26 }
  0xfd   :  { %395 = vmatmul.mubr.bf16.vlgmr.msra.gmra.mrb[0].mxu0 %v164_v27 }
 0x1d0   :  { %v270_v29 = vpop.f32.mrb[0].mxu0 }
 0x1d1   :  { %v271_v30 = vadd.f32 %v342_v28, %v270_v29  ;;  %v396_v31 = vpop.f32.mrb[1].mxu0 }
 0x1d2   :  { %v273_v32 = vpop.f32.mrb[2].mxu0 }
 0x1d3   :  { %v276_v33 = vmax.f32 %v271_v30, 0.0  ;;  %v397_v34 = vpop.f32.mrb[3].mxu0 }
 0x1d5   :  { %v278_v35 = vpack.c.bf16 %v276_v33, %v276_v33 }
 0x1d7   :  { %399 = vmatpush3.bf16.xpose.msra.mxu1 %v278_v35 }
 0x1de   :  { %401 = vmatmul.mubr.bf16.vlgmr.msra.gmra.mrb[8].mxu1 %v277_v36 }
 0x2b1   :  { %v315_v38 = vpop.f32.mrb[8].mxu1 }
 0x2b2   :  { %v316_v39 = vadd.f32 %v315_v38, %v280_v37  ;;  %v402_v40 = vpop.f32.mrb[9].mxu1 }
 0x2b3   :  { %v318_v41 = vpop.f32.mrb[10].mxu1 }
 0x2b4   :  { %v403_v42 = vpop.f32.mrb[11].mxu1  ;;  %322 = vst.msk [vmem:[#allocation6] sm:$0x1] %vm321_vm5, %v316_v39 }
 0x2b5   :  { %452 = shalt.err (!%p449_p12)
}
 0x2b6   :  { %s453_s15 = scalar_lea.hbm %s584_s9, 16 }
 0x2b7   :  { %p454_p13 = scmp.ne.s32.totalorder %s584_s9, %s453_s15  ;;  %p457_p0 = scmp.lt.u32.totalorder %s453_s15, %s584_s9 }
 0x2b9   :  { %p459_p1 = pnand %p457_p0, %p454_p13 }
 0x2bb   :  { %462 = shalt.err (!%p459_p1)
}
 0x2bc   :  { %332 = dma.vmem_to_hbm [thread:$0]  %s330_s13, 16, %s584_s9, [#allocation5]  }
 0x2bd   :  { %465 = dma.done.wait [#allocation5], 16  }
 0x2be   :  { %466 = vsyncadd [#allocation5], 4294967280 }
 0x2bf   :  { %336 = vsyncpa [#allocation4], 1 }
 0x2c0   :  { %337 = vsyncpa [#allocation5], 1 }

</bundles_post_ra>
